<compile_context>
chip_gen: v7x
topology: tpu7x:2x2x1
jax: 0.10.0
libtpu: 0.0.40
codegen_flags: <defaults>
</compile_context>

<pallas_src>
import functools
import math

import jax
import jax.numpy as jnp
from jax import lax
from jax.experimental import pallas as pl
from jax.experimental.pallas import tpu as pltpu


def _inner_product_decoder_kernel(zi_ref, zj_ref, o_ref):
    """Compute one (tm, tn) tile of sigmoid(z @ z.T)."""
    # Contract the latent dim of both operands so the MXU performs the z.T
    # contraction natively (no materialized XLU transpose).
    s = lax.dot_general(
        zi_ref[...], zj_ref[...],
        dimension_numbers=(((1,), (1,)), ((), ())),
        preferred_element_type=jnp.float32,
    )
    o_ref[...] = jax.nn.sigmoid(s).astype(o_ref.dtype)


def _round_up(x, m):
    return ((x + m - 1) // m) * m


@functools.partial(jax.jit, static_argnames=("tm", "tn", "out_dtype"))
def inner_product_decoder(z, *, tm=512, tn=2048, out_dtype=None):
    """adj = sigmoid(z @ z.T) with a tiled Pallas kernel (eval-mode decoder).

    Args:
      z: (N, D) latent node embeddings (D is typically 16 for VGAE).
      tm, tn: output tile sizes (clamped for small N). tn should stay a
        multiple of 128 for lane-dense, unmasked stores. On v7x keep
        N_pad // tm >= 2 so both TensorCores get work.
      out_dtype: output dtype. jnp.bfloat16 halves the N^2 HBM writeback that
        dominates this kernel (intentional precision trade on [0,1] probs);
        default None keeps z.dtype (matches the PyTorch module).
    """
    N, D = z.shape
    if out_dtype is None:
        out_dtype = z.dtype
    out_itemsize = jnp.dtype(out_dtype).itemsize

    # Clamp tiles for small graphs while keeping (8, 128) vreg tiling legal.
    N_128 = _round_up(N, 128)
    tm = min(tm, N_128)
    tn = min(tn, N_128)
    assert tm % 8 == 0 and tn % 128 == 0, "tm must be a multiple of 8, tn of 128"

    # Pad N so both tile sizes divide it exactly (unmasked stores, simple grid);
    # padded rows of z are zero and the padded output region is sliced away.
    N_pad = _round_up(N_128, math.lcm(tm, tn))
    if N_pad != N:
        z_p = jnp.zeros((N_pad, D), z.dtype).at[:N].set(z)
    else:
        z_p = z

    grid = (N_pad // tm, N_pad // tn)

    # VMEM budget: double-buffered output tile + f32 matmul/sigmoid temp +
    # double-buffered (lane-padded) z tiles + headroom. Capped at 48 MiB so it
    # also fits v7x's 64 MiB physical VMEM.
    lane_d = _round_up(D, 128)
    vmem_bytes = (2 * tm * tn * out_itemsize
                  + tm * tn * 4
                  + 2 * (tm + tn) * lane_d * 4
                  + (2 << 20))
    vmem_limit = min(max(vmem_bytes, 16 << 20), 48 << 20)

    adj = pl.pallas_call(
        _inner_product_decoder_kernel,
        out_shape=jax.ShapeDtypeStruct((N_pad, N_pad), out_dtype),
        grid_spec=pltpu.PrefetchScalarGridSpec(
            num_scalar_prefetch=0,
            grid=grid,
            in_specs=[
                # Rows i of z (LHS): re-fetched only when i changes.
                pl.BlockSpec((tm, D), lambda i, j: (i, 0)),
                # Rows j of z (RHS tile): fixed ~2*tn*lane_d*4 B footprint,
                # no VMEM-resident whole-z copy.
                pl.BlockSpec((tn, D), lambda i, j: (j, 0)),
            ],
            out_specs=pl.BlockSpec((tm, tn), lambda i, j: (i, j)),
        ),
        compiler_params=pltpu.CompilerParams(
            dimension_semantics=("parallel", "parallel"),
            vmem_limit_bytes=vmem_limit,
        ),
        cost_estimate=pl.CostEstimate(
            flops=2 * N_pad * N_pad * D,
            transcendentals=N_pad * N_pad,
            bytes_accessed=N_pad * N_pad * out_itemsize
                           + 2 * N_pad * D * jnp.dtype(z.dtype).itemsize,
        ),
    )(z_p, z_p)

    if N_pad != N:
        adj = adj[:N, :N]
    return adj


def inner_product_decoder_ref(z):
    return jax.nn.sigmoid(z @ z.T)


if __name__ == "__main__":
    # Module __init__ has no learnable parameters (only dropout rate + act).
    key = jax.random.PRNGKey(0)
    N, D = 256, 16  # N graph nodes, D latent dims (typical VGAE hidden2=16)
    z = jax.random.normal(key, (N, D), dtype=jnp.float32)
    ref = inner_product_decoder_ref(z)

    # 1) f32 output (matches the PyTorch module exactly). Small tiles force a
    #    2x2 grid so both BlockSpec index maps are exercised.
    adj = jax.block_until_ready(inner_product_decoder(z, tm=128, tn=128))
    assert adj.shape == (N, N)
    assert jnp.allclose(adj, ref, atol=1e-5, rtol=1e-5), "f32 mismatch vs reference"

    # 2) Ragged N (not a multiple of 128) exercises the pad-and-slice path.
    z2 = jax.random.normal(jax.random.PRNGKey(1), (200, D), dtype=jnp.float32)
    adj2 = jax.block_until_ready(inner_product_decoder(z2, tm=128, tn=128))
    ref2 = inner_product_decoder_ref(z2)
    assert adj2.shape == (200, 200)
    assert jnp.allclose(adj2, ref2, atol=1e-5, rtol=1e-5), "ragged-N mismatch"

    # 3) bf16 output (perf option: halves HBM writeback), f32 accumulation.
    adj_bf16 = jax.block_until_ready(
        inner_product_decoder(z, tm=128, tn=128, out_dtype=jnp.bfloat16))
    assert adj_bf16.dtype == jnp.bfloat16
    assert jnp.allclose(adj_bf16.astype(jnp.float32), ref, atol=5e-3, rtol=5e-3), \
        "bf16 mismatch vs reference"

    print("KERNEL_OK")
</pallas_src>

<mosaic_0001>
module attributes {stable_mosaic.version = 11 : i64} {
  func.func @_inner_product_decoder_kernel(%arg0: i32, %arg1: i32, %arg2: memref<128x16xf32, #tpu.memory_space<vmem>>, %arg3: memref<128x16xf32, #tpu.memory_space<vmem>>, %arg4: memref<128x128xf32, #tpu.memory_space<vmem>>) attributes {dimension_semantics = [#tpu.dimension_semantics<parallel>, #tpu.dimension_semantics<parallel>], iteration_bounds = array<i64: 2, 2>, scalar_prefetch = 0 : i64, scratch_operands = 0 : i64, tpu.core_type = #tpu.core_type<tc>, window_params = [{transform_indices = @transform_0, window_bounds = array<i64: 128, 16>}, {transform_indices = @transform_1, window_bounds = array<i64: 128, 16>}, {transform_indices = @transform_2, window_bounds = array<i64: 128, 128>}]} {
    %c0 = arith.constant 0 : index
    %c0_0 = arith.constant 0 : index
    %0 = vector.load %arg2[%c0, %c0_0] : memref<128x16xf32, #tpu.memory_space<vmem>>, vector<128x16xf32>
    %c0_1 = arith.constant 0 : index
    %c0_2 = arith.constant 0 : index
    %1 = vector.load %arg3[%c0_1, %c0_2] : memref<128x16xf32, #tpu.memory_space<vmem>>, vector<128x16xf32>
    %cst = arith.constant dense<0.000000e+00> : vector<128x128xf32>
    %2 = tpu.matmul %0, %1, %cst {dimension_numbers = #tpu.dot_dimension_numbers<[1], [1], [0], [0], [0, 0, 1, 0], [], []>} : vector<128x16xf32>, vector<128x16xf32>, vector<128x128xf32> -> vector<128x128xf32>
    %3 = arith.negf %2 : vector<128x128xf32>
    %4 = math.exp %3 : vector<128x128xf32>
    %cst_3 = arith.constant 1.000000e+00 : f32
    %5 = vector.broadcast %cst_3 : f32 to vector<128x128xf32>
    %6 = arith.addf %5, %4 : vector<128x128xf32>
    %7 = arith.divf %5, %6 : vector<128x128xf32>
    %c0_4 = arith.constant 0 : index
    %c0_5 = arith.constant 0 : index
    %8 = vector.load %arg4[%c0_4, %c0_5] : memref<128x128xf32, #tpu.memory_space<vmem>>, vector<128x128xf32>
    tpu.vector_store %arg4[%c0_4, %c0_5], %7 {strides = array<i32>} : memref<128x128xf32, #tpu.memory_space<vmem>>, vector<128x128xf32>,
    return
  }
  func.func @transform_0(%arg0: i32, %arg1: i32) -> (i32, i32) {
    %c0_i32 = arith.constant 0 : i32
    %c0_i32_0 = arith.constant 0 : i32
    return %arg0, %c0_i32 : i32, i32
  }
  func.func @transform_1(%arg0: i32, %arg1: i32) -> (i32, i32) {
    %c0_i32 = arith.constant 0 : i32
    %c0_i32_0 = arith.constant 0 : i32
    return %arg1, %c0_i32 : i32, i32
  }
  func.func @transform_2(%arg0: i32, %arg1: i32) -> (i32, i32) {
    %c0_i32 = arith.constant 0 : i32
    return %arg0, %arg1 : i32, i32
  }
}

</mosaic_0001>

<bundles_post_ra>
// kernel: inner_product_decoder.1
= control target key start
LH: loop header
LB: loop body
LE: loop exit
PB: predicated region body
PF: predicated region fallthrough
CT: control target
= control target key end

     0   :  { %7 = vsyncpa [#allocation3], 0  ;;  %s1426_s0 = inlined_call_operand.vmem [shape: f32[256,16], index: 0, kind: input, shape index: {}, may-alias: {0,1}]   ;;  %s1427_s1 = inlined_call_operand.vmem [shape: f32[256,16], index: 1, kind: input, shape index: {}, may-alias: {0,1}]   ;;  %s1428_s2 = inlined_call_operand.hbm [shape: f32[256,256], index: 2, kind: output, shape index: {}]  }
   0x1   :  { %9 = vsyncpa [#allocation3 + $0x1], 0  ;;  %s1140_s9 = smov 0   ;;  %s1142_s10 = smov 0  }
   0x2   :  { %s1144_s11 = smov 0   ;;  %s1146_s12 = smov 0  }
   0x3   :  { %s1148_s13 = smov 0   ;;  %s1150_s14 = smov 0  }
   0x4   :  { %s1152_s15 = smov 0   ;;  %s1154_s16 = smov 0  }
   0x5 LB: > { %s670_s17 = sadd.s32 4294967295, %s1119_s16   ;;  %s671_s18 = sadd.s32 4294967294, %s1119_s16   ;;  %s1119_s16 = sphi %s1154_s16, %s15_s16   ;;  %s1115_s15 = sphi %s1152_s15, %s1439_s15   ;;  %s1111_s14 = sphi %s1150_s14, %s1438_s14   ;;  %s1107_s13 = sphi %s1148_s13, %s1437_s13   ;;  %s1103_s12 = sphi %s1146_s12, %s1436_s12   ;;  %s1099_s11 = sphi %s1144_s11, %s1435_s11   ;;  %s1095_s10 = sphi %s1142_s10, %s1434_s10   ;;  %s1091_s9 = sphi %s1140_s9, %s1433_s9  }
   0x6   : > { %s24_s19 = sadd.s32 1, %s1111_s14  ;;  %s27_s20 = sadd.s32 1, %s1115_s15 }
   0x7   : > { %p25_p0 = scmp.ge.s32.totalorder %s24_s19, 2  ;;  %p98_p1 = scmp.ne.s32.totalorder %s1099_s11, %s1095_s10 }
   0x8   : > { %p99_p2 = scmp.eq.s32.totalorder %s670_s17, 3  ;;  %p104_p5 = scmp.ne.s32.totalorder %s1095_s10, %s1091_s9 }
   0x9   : > { %s1441_s19 = smov (%p25_p0, %s24_s19), 0  ;;  %s1443_s20 = smov (!%p25_p0, %s27_s20), %s1115_s15 }
   0xa   : > { %s84_s21 = ssub.s32 %s1111_s14, %s1441_s19  ;;  %p1191_p3 = por %p99_p2, %p98_p1 }
   0xb   : > { %p29_p4 = scmp.ge.s32.totalorder %s1443_s20, 2  ;;  %p105_p6 = scmp.eq.s32.totalorder %s671_s18, 3 }
   0xc   : > { %p674_p7 = scmp.ge.s32.totalorder %s1119_s16, 1  ;;  %p141_p9 = scmp.lt.s32.totalorder %s1119_s16, 5 }
   0xd   : > { %s1445_s20 = smov (%p29_p4, %s1443_s20), 0  ;;  %p1200_p8 = por %p105_p6, %p104_p5 }
   0xe   : > { %s83_s24 = ssub.s32 %s1115_s15, %s1445_s20  ;;  %s88_s25 = sadd.s32 1, %s1099_s11 }
   0xf   : > { %s85_s26 = sor.u32 %s84_s21, %s83_s24  ;;  %p142_p10 = pnand %p674_p7, %p141_p9 }
  0x10   : > { %p86_p11 = scmp.eq.s32.totalorder %s85_s26, 0  ;;  %s678_s28 = sshll.u32 (!%p142_p10), %s1103_s12, 4  ;;  %vm213_vm0 = vcmask (!%p142_p10), 130048  }
  0x11   : > { %145 = sbr.rel (%p142_p10) target bundleno = 376 (0x178), region = 28  ;;  %s676_s29 = sshll.u32 (!%p142_p10), %s1107_s13, 4  ;;  %vm1220_vm1 = vmpackc.low (!%p142_p10), %vm213_vm0, %vm213_vm0 }
  0x12   : > { %s1209_s27 = scalar_select %p86_p11, %s1099_s11, %s88_s25  }
  0x13   : > { %p175_p12 = scmp.lt.s32.totalorder (!%p142_p10), %s678_s28, 31  ;;  %p169_p13 = scmp.lt.s32.totalorder (!%p142_p10), %s676_s29, 31 }
  0x14   : > { %s165_s18 = sand.u32 (!%p142_p10), 1, %s1095_s10   ;;  %s734_s25 = sshll.u32 (!%p142_p10), %s1107_s13, 5 }
  0x15   : > { %s675_s21 = sshll.u32 (!%p142_p10), %s165_s18, 7  ;;  %s580_s26 = sadd.s32 (!%p142_p10), %s1103_s12, %s734_s25 }
  0x16   : > { %s1344_s24 = scalar_lea.vmem (!%p142_p10), [#allocation2], %s675_s21  ;;  %s1374_s12 = scalar_lea.sflag (!%p142_p10), [#allocation3], %s165_s18 }
  0x18   : > { %s1447_s28 = smov (!%p175_p12, %s678_s28), 31  ;;  %s1449_s29 = smov (!%p169_p13, %s676_s29), 31 }
  0x19   : > { %s679_s30 = sshll.u32 %s1447_s28, 3  ;;  %s677_s6 = sshll.u32 %s1449_s29, 3 }
  0x1a   : > { %s1216_s5 = scalar_lea.vmem %s1427_s1, %s679_s30  ;;  %s1231_s17 = scalar_lea.vmem %s1426_s0, %s677_s6 }
  0x1b   : > { %v197_v1 = vld [vmem:[%s1216_s5] sm:$0xff]  ;;  %v198_v2 = vld [vmem:[%s1216_s5 + $0x8] sm:$0xff]  ;;  %v199_v3 = vld [vmem:[%s1216_s5 + $0x10] sm:$0xff]  ;;  %s731_s28 = sshll.u32 %s580_s26, 7  ;;  %s583_s29 = sshll.u32 %s1344_s24, 4  ;;  %s1367_s29 = int_to_ptr.vmem [resolvable:$true] %s583_s29 }
  0x1c   : > { %v823_v4 = vpack.c.bf16 %v198_v2, %v197_v1  ;;  %v200_v5 = vld [vmem:[%s1216_s5 + $0x18] sm:$0xff]  ;;  %v181_v7 = vld [vmem:[%s1231_s17] sm:$0xff]  ;;  %v202_v10 = vld [vmem:[%s1216_s5 + $0x28] sm:$0xff]  ;;  %s1365_s4 = scalar_lea.hbm %s1428_s2, %s731_s28  ;;  %s1025_s13 = scalar_lea.vmem %s1367_s29, 2048 }
  0x1d   : > { %v829_v6 = vpack.c.bf16 %v200_v5, %v199_v3  ;;  %v189_v8 = vld [vmem:[%s1231_s17 + $0x40] sm:$0xff]  ;;  %799 = vmatprep.mubr.msk.f32.mxu0 %vm213_vm0, %v181_v7  ;;  %v203_v12 = vld [vmem:[%s1216_s5 + $0x30] sm:$0xff]  ;;  %v204_v13 = vld [vmem:[%s1216_s5 + $0x38] sm:$0xff]  ;;  %p1026_p0 = scmp.ne.s32.totalorder %s1367_s29, %s1025_s13 }
  0x1e   : > { %825 = vmatprep.subr.msk.bf16.mxu0 %vm1220_vm1, %v823_v4  ;;  %871 = vmatprep.subr.msk.bf16.mxu1 %vm1220_vm1, %v823_v4  ;;  %v201_v9 = vld [vmem:[%s1216_s5 + $0x20] sm:$0xff]  ;;  %v841_v14 = vpack.c.bf16 %v204_v13, %v203_v12  ;;  %v206_v16 = vld [vmem:[%s1216_s5 + $0x48] sm:$0xff]  ;;  %v207_v18 = vld [vmem:[%s1216_s5 + $0x50] sm:$0xff] }
  0x1f   : > { %828 = vmatpush3.bf16.xpose.msk.msra.mxu0 %vm1220_vm1, %v823_v4  ;;  %879 = vmatpush3.bf16.xpose.msk.msra.mxu1 %vm1220_vm1, %v823_v4  ;;  %v835_v11 = vpack.c.bf16 %v202_v10, %v201_v9  ;;  %v205_v15 = vld [vmem:[%s1216_s5 + $0x40] sm:$0xff]  ;;  %v208_v19 = vld [vmem:[%s1216_s5 + $0x58] sm:$0xff]  ;;  %v210_v22 = vld [vmem:[%s1216_s5 + $0x68] sm:$0xff]  ;;  %p1027_p1 = pnand %p1026_p0, %p1191_p3 }
  0x20   : > { %831 = vmatprep.subr.msk.bf16.mxu0 %vm1220_vm1, %v829_v6  ;;  %872 = vmatprep.subr.msk.bf16.mxu1 %vm1220_vm1, %v829_v6  ;;  %v847_v17 = vpack.c.bf16 %v206_v16, %v205_v15  ;;  %v853_v20 = vpack.c.bf16 %v208_v19, %v207_v18  ;;  %v209_v21 = vld [vmem:[%s1216_s5 + $0x60] sm:$0xff]  ;;  %v211_v24 = vld [vmem:[%s1216_s5 + $0x70] sm:$0xff]  ;;  %v212_v25 = vld [vmem:[%s1216_s5 + $0x78] sm:$0xff]  ;;  %s1121_s5 = smov [#allocation2]  }
  0x21   : > { %811 = vmatprep.mubr.msk.f32.mxu1 %vm213_vm0, %v189_v8  ;;  %v859_v23 = vpack.c.bf16 %v210_v22, %v209_v21  ;;  %v865_v26 = vpack.c.bf16 %v212_v25, %v211_v24  ;;  %v182_v27 = vld [vmem:[%s1231_s17 + $0x8] sm:$0xff]  ;;  %v183_v29 = vld [vmem:[%s1231_s17 + $0x10] sm:$0xff]  ;;  %v184_v31 = vld [vmem:[%s1231_s17 + $0x18] sm:$0xff]  ;;  %p1028_p2 = pneg %p1027_p1  ;;  %s1029_s6 = sshll.u32 %s1121_s5, 4  ;;  %s1030_s6 = int_to_ptr.vmem [resolvable:$false] %s1029_s6 }
  0x22   : > { %v190_v28 = vld [vmem:[%s1231_s17 + $0x48] sm:$0xff]  ;;  %v191_v30 = vld [vmem:[%s1231_s17 + $0x50] sm:$0xff]  ;;  %v192_v32 = vld [vmem:[%s1231_s17 + $0x58] sm:$0xff]  ;;  %s1031_s7 = scalar_lea.vmem %s1030_s6, 4096  ;;  %p1032_p4 = scmp.lt.s32.totalorder %s1367_s29, %s1030_s6 }
  0x23   : > { %v185_v33 = vld [vmem:[%s1231_s17 + $0x20] sm:$0xff]  ;;  %v186_v35 = vld [vmem:[%s1231_s17 + $0x28] sm:$0xff]  ;;  %v187_v37 = vld [vmem:[%s1231_s17 + $0x30] sm:$0xff]  ;;  %p1033_p5 = scmp.lt.s32.totalorder %s1031_s7, %s1025_s13 }
  0x24   : > { %v193_v34 = vld [vmem:[%s1231_s17 + $0x60] sm:$0xff]  ;;  %v194_v36 = vld [vmem:[%s1231_s17 + $0x68] sm:$0xff]  ;;  %v195_v38 = vld [vmem:[%s1231_s17 + $0x70] sm:$0xff] }
  0x25   : > { %v188_v39 = vld [vmem:[%s1231_s17 + $0x38] sm:$0xff]  ;;  %p1034_p6 = por %p1033_p5, %p1032_p4 }
  0x26   : > { %v196_v40 = vld [vmem:[%s1231_s17 + $0x78] sm:$0xff] }
  0x27   : > { %834 = vmatpush3.bf16.xpose.msk.msra.mxu0 %vm1220_vm1, %v829_v6  ;;  %880 = vmatpush3.bf16.xpose.msk.msra.mxu1 %vm1220_vm1, %v829_v6  ;;  %p1035_p7 = pnand %p1034_p6, %p1028_p2 }
  0x28   : > { %837 = vmatprep.subr.msk.bf16.mxu0 %vm1220_vm1, %v835_v11  ;;  %873 = vmatprep.subr.msk.bf16.mxu1 %vm1220_vm1, %v835_v11 }
  0x2f   : > { %840 = vmatpush3.bf16.xpose.msk.msra.mxu0 %vm1220_vm1, %v835_v11  ;;  %881 = vmatpush3.bf16.xpose.msk.msra.mxu1 %vm1220_vm1, %v835_v11 }
  0x30   : > { %843 = vmatprep.subr.msk.bf16.mxu0 %vm1220_vm1, %v841_v14  ;;  %874 = vmatprep.subr.msk.bf16.mxu1 %vm1220_vm1, %v841_v14 }
  0x37   : > { %846 = vmatpush3.bf16.xpose.msk.msra.mxu0 %vm1220_vm1, %v841_v14  ;;  %882 = vmatpush3.bf16.xpose.msk.msra.mxu1 %vm1220_vm1, %v841_v14 }
  0x38   : > { %849 = vmatprep.subr.msk.bf16.mxu0 %vm1220_vm1, %v847_v17  ;;  %875 = vmatprep.subr.msk.bf16.mxu1 %vm1220_vm1, %v847_v17 }
  0x3f   : > { %852 = vmatpush3.bf16.xpose.msk.msra.mxu0 %vm1220_vm1, %v847_v17  ;;  %883 = vmatpush3.bf16.xpose.msk.msra.mxu1 %vm1220_vm1, %v847_v17 }
  0x40   : > { %855 = vmatprep.subr.msk.bf16.mxu0 %vm1220_vm1, %v853_v20  ;;  %876 = vmatprep.subr.msk.bf16.mxu1 %vm1220_vm1, %v853_v20 }
  0x47   : > { %858 = vmatpush3.bf16.xpose.msk.msra.mxu0 %vm1220_vm1, %v853_v20  ;;  %884 = vmatpush3.bf16.xpose.msk.msra.mxu1 %vm1220_vm1, %v853_v20 }
  0x48   : > { %861 = vmatprep.subr.msk.bf16.mxu0 %vm1220_vm1, %v859_v23  ;;  %877 = vmatprep.subr.msk.bf16.mxu1 %vm1220_vm1, %v859_v23 }
  0x4f   : > { %864 = vmatpush3.bf16.xpose.msk.msra.mxu0 %vm1220_vm1, %v859_v23  ;;  %885 = vmatpush3.bf16.xpose.msk.msra.mxu1 %vm1220_vm1, %v859_v23 }
  0x50   : > { %867 = vmatprep.subr.msk.bf16.mxu0 %vm1220_vm1, %v865_v26  ;;  %878 = vmatprep.subr.msk.bf16.mxu1 %vm1220_vm1, %v865_v26 }
  0x57   : > { %870 = vmatpush3.bf16.xpose.msk.msra.mxu0 %vm1220_vm1, %v865_v26  ;;  %886 = vmatpush3.bf16.xpose.msk.msra.mxu1 %vm1220_vm1, %v865_v26 }
  0x5e   : > { %800 = vmatmul.mubr.msk.f32.vlgmr.msra.gmra.mrb[0].mxu0 %vm213_vm0, %v182_v27  ;;  %812 = vmatmul.mubr.msk.f32.vlgmr.msra.gmra.mrb[0].mxu1 %vm213_vm0, %v190_v28 }
  0x5f   : > { %802 = vmatprep.mubr.msk.f32.mxu0 %vm213_vm0, %v183_v29  ;;  %814 = vmatprep.mubr.msk.f32.mxu1 %vm213_vm0, %v191_v30 }
  0x62   : > { %803 = vmatmul.mubr.msk.f32.gmra.mrb[2].mxu0 %vm213_vm0, %v184_v31  ;;  %815 = vmatmul.mubr.msk.f32.gmra.mrb[2].mxu1 %vm213_vm0, %v192_v32 }
  0x63   : > { %805 = vmatprep.mubr.msk.f32.mxu0 %vm213_vm0, %v185_v33  ;;  %817 = vmatprep.mubr.msk.f32.mxu1 %vm213_vm0, %v193_v34 }
  0x66   : > { %806 = vmatmul.mubr.msk.f32.gmra.mrb[4].mxu0 %vm213_vm0, %v186_v35  ;;  %818 = vmatmul.mubr.msk.f32.gmra.mrb[4].mxu1 %vm213_vm0, %v194_v36 }
  0x67   : > { %808 = vmatprep.mubr.msk.f32.mxu0 %vm213_vm0, %v187_v37  ;;  %820 = vmatprep.mubr.msk.f32.mxu1 %vm213_vm0, %v195_v38 }
  0x6a   : > { %809 = vmatmul.mubr.msk.f32.gmra.mrb[6].mxu0 %vm213_vm0, %v188_v39  ;;  %821 = vmatmul.mubr.msk.f32.gmra.mrb[6].mxu1 %vm213_vm0, %v196_v40 }
 0x131   : > { %v801_v41 = vpop.f32.mrb[0].mxu0  ;;  %v813_v42 = vpop.f32.mrb[0].mxu1 }
 0x132   : > { %v713_v43 = vmul.f32 -1.442695, %v801_v41  ;;  %v721_v44 = vmul.f32 -1.442695, %v813_v42  ;;  %v376_v45 = vpop.f32.mrb[1].mxu0  ;;  %v416_v46 = vpop.f32.mrb[1].mxu1 }
 0x133   : > { %v712_v47 = vmul.f32 -1.442695, %v376_v45  ;;  %v720_v48 = vmul.f32 -1.442695, %v416_v46 }
 0x134   : > { %961 = vpow2.f32 %v713_v43 }
 0x135   : > { %963 = vpow2.f32 %v721_v44  ;;  %v804_v49 = vpop.f32.mrb[2].mxu0  ;;  %v816_v50 = vpop.f32.mrb[2].mxu1 }
 0x136   : > { %965 = vpow2.f32 %v712_v47  ;;  %v715_v51 = vmul.f32 -1.442695, %v804_v49  ;;  %v723_v52 = vmul.f32 -1.442695, %v816_v50  ;;  %v386_v53 = vpop.f32.mrb[3].mxu0  ;;  %v426_v54 = vpop.f32.mrb[3].mxu1 }
 0x137   : > { %967 = vpow2.f32 %v720_v48  ;;  %v714_v55 = vmul.f32 -1.442695, %v386_v53  ;;  %v722_v56 = vmul.f32 -1.442695, %v426_v54 }
 0x138   : > { %969 = vpow2.f32 %v715_v51 }
 0x139   : > { %971 = vpow2.f32 %v723_v52  ;;  %v807_v57 = vpop.f32.mrb[4].mxu0  ;;  %v819_v58 = vpop.f32.mrb[4].mxu1 }
 0x13a   : > { %973 = vpow2.f32 %v714_v55  ;;  %v717_v59 = vmul.f32 -1.442695, %v807_v57  ;;  %v725_v60 = vmul.f32 -1.442695, %v819_v58  ;;  %v396_v61 = vpop.f32.mrb[5].mxu0  ;;  %v436_v62 = vpop.f32.mrb[5].mxu1 }
 0x13b   : > { %975 = vpow2.f32 %v722_v56  ;;  %v716_v63 = vmul.f32 -1.442695, %v396_v61  ;;  %v724_v0 = vmul.f32 -1.442695, %v436_v62 }
 0x13c   : > { %977 = vpow2.f32 %v717_v59 }
 0x13d   : > { %979 = vpow2.f32 %v725_v60  ;;  %v810_v1 = vpop.f32.mrb[6].mxu0  ;;  %v822_v2 = vpop.f32.mrb[6].mxu1 }
 0x13e   : > { %v962_v3 = vpop.eup %961  ;;  %981 = vpow2.f32 %v716_v63  ;;  %v719_v4 = vmul.f32 -1.442695, %v810_v1  ;;  %v406_v5 = vpop.f32.mrb[7].mxu0  ;;  %v727_v31 = vmul.f32 -1.442695, %v822_v2 }
 0x13f   : > { %v446_v6 = vpop.f32.mrb[7].mxu1  ;;  %v964_v7 = vpop.eup %963  ;;  %v504_v8 = vadd.f32 1.0, %v962_v3  ;;  %983 = vpow2.f32 %v724_v0  ;;  %v718_v34 = vmul.f32 -1.442695, %v406_v5 }
 0x140   : > { %v966_v9 = vpop.eup %965  ;;  %v512_v10 = vadd.f32 1.0, %v964_v7  ;;  %985 = vpow2.f32 %v719_v4  ;;  %v726_v36 = vmul.f32 -1.442695, %v446_v6 }
 0x141   : > { %v968_v11 = vpop.eup %967  ;;  %987 = vrcp.f32 %v504_v8  ;;  %v503_v12 = vadd.f32 1.0, %v966_v9 }
 0x142   : > { %v970_v13 = vpop.eup %969  ;;  %989 = vrcp.f32 %v512_v10  ;;  %v511_v14 = vadd.f32 1.0, %v968_v11 }
 0x143   : > { %v972_v15 = vpop.eup %971  ;;  %991 = vrcp.f32 %v503_v12  ;;  %v506_v16 = vadd.f32 1.0, %v970_v13 }
 0x144   : > { %v974_v17 = vpop.eup %973  ;;  %993 = vrcp.f32 %v511_v14  ;;  %v514_v18 = vadd.f32 1.0, %v972_v15 }
 0x145   : > { %v976_v19 = vpop.eup %975  ;;  %995 = vrcp.f32 %v506_v16  ;;  %v505_v20 = vadd.f32 1.0, %v974_v17 }
 0x146   : > { %v978_v21 = vpop.eup %977  ;;  %997 = vrcp.f32 %v514_v18  ;;  %v513_v22 = vadd.f32 1.0, %v976_v19 }
 0x147   : > { %v980_v23 = vpop.eup %979  ;;  %999 = vrcp.f32 %v505_v20  ;;  %v508_v24 = vadd.f32 1.0, %v978_v21 }
 0x148   : > { %v982_v25 = vpop.eup %981  ;;  %1001 = vrcp.f32 %v513_v22  ;;  %v516_v26 = vadd.f32 1.0, %v980_v23 }
 0x149   : > { %v984_v27 = vpop.eup %983  ;;  %1003 = vrcp.f32 %v508_v24  ;;  %v507_v28 = vadd.f32 1.0, %v982_v25 }
 0x14a   : > { %v986_v29 = vpop.eup %985  ;;  %1005 = vrcp.f32 %v516_v26  ;;  %v515_v30 = vadd.f32 1.0, %v984_v27 }
 0x14b   : > { %v988_v32 = vpop.eup %987  ;;  %1007 = vrcp.f32 %v507_v28  ;;  %v510_v33 = vadd.f32 1.0, %v986_v29 }
 0x14c   : > { %v990_v35 = vpop.eup %989  ;;  %552 = vst [vmem:[%s1344_s24 + $0x8] sm:$0xff] %v988_v32  ;;  %1009 = vrcp.f32 %v515_v30 }
 0x14d   : > { %v992_v37 = vpop.eup %991  ;;  %560 = vst [vmem:[%s1344_s24 + $0x48] sm:$0xff] %v990_v35  ;;  %1011 = vrcp.f32 %v510_v33 }
 0x14e   : > { %v994_v38 = vpop.eup %993  ;;  %551 = vst [vmem:[%s1344_s24] sm:$0xff] %v992_v37  ;;  %1013 = vpow2.f32 %v727_v31 }
 0x14f   : > { %v996_v39 = vpop.eup %995  ;;  %559 = vst [vmem:[%s1344_s24 + $0x40] sm:$0xff] %v994_v38  ;;  %1015 = vpow2.f32 %v718_v34 }
 0x150   : > { %v998_v40 = vpop.eup %997  ;;  %554 = vst [vmem:[%s1344_s24 + $0x18] sm:$0xff] %v996_v39  ;;  %1017 = vpow2.f32 %v726_v36 }
 0x151   : > { %v1000_v41 = vpop.eup %999  ;;  %562 = vst [vmem:[%s1344_s24 + $0x58] sm:$0xff] %v998_v40 }
 0x152   : > { %v1002_v42 = vpop.eup %1001  ;;  %553 = vst [vmem:[%s1344_s24 + $0x10] sm:$0xff] %v1000_v41 }
 0x153   : > { %v1004_v43 = vpop.eup %1003  ;;  %561 = vst [vmem:[%s1344_s24 + $0x50] sm:$0xff] %v1002_v42 }
 0x154   : > { %v1006_v44 = vpop.eup %1005  ;;  %556 = vst [vmem:[%s1344_s24 + $0x28] sm:$0xff] %v1004_v43 }
 0x155   : > { %v1008_v45 = vpop.eup %1007  ;;  %564 = vst [vmem:[%s1344_s24 + $0x68] sm:$0xff] %v1006_v44 }
 0x156   : > { %v1010_v46 = vpop.eup %1009  ;;  %555 = vst [vmem:[%s1344_s24 + $0x20] sm:$0xff] %v1008_v45 }
 0x157   : > { %v1012_v47 = vpop.eup %1011  ;;  %563 = vst [vmem:[%s1344_s24 + $0x60] sm:$0xff] %v1010_v46 }
 0x158   : > { %v1014_v48 = vpop.eup %1013  ;;  %558 = vst [vmem:[%s1344_s24 + $0x38] sm:$0xff] %v1012_v47 }
 0x159   : > { %v1016_v49 = vpop.eup %1015  ;;  %v518_v50 = vadd.f32 1.0, %v1014_v48 }
 0x15a   : > { %v1018_v51 = vpop.eup %1017  ;;  %v509_v52 = vadd.f32 1.0, %v1016_v49 }
 0x15b   : > { %1019 = vrcp.f32 %v518_v50  ;;  %v517_v53 = vadd.f32 1.0, %v1018_v51 }
 0x15c   : > { %1021 = vrcp.f32 %v509_v52 }
 0x15d   : > { %1023 = vrcp.f32 %v517_v53 }
 0x165   : > { %v1020_v54 = vpop.eup %1019 }
 0x166   : > { %v1022_v55 = vpop.eup %1021  ;;  %566 = vst [vmem:[%s1344_s24 + $0x78] sm:$0xff] %v1020_v54 }
 0x167   : > { %v1024_v56 = vpop.eup %1023  ;;  %557 = vst [vmem:[%s1344_s24 + $0x30] sm:$0xff] %v1022_v55 }
 0x168   : > { %565 = vst [vmem:[%s1344_s24 + $0x70] sm:$0xff] %v1024_v56 }
 0x169   : > { %1038 = shalt.err (!%p1035_p7)
}
 0x16a   : > { %s1039_s8 = scalar_lea.hbm %s1365_s4, 2048  ;;  %s1043_s21 = scalar_lea.hbm %s1428_s2, 8192 }
 0x16b   : > { %p1040_p9 = scmp.ne.s32.totalorder %s1365_s4, %s1039_s8  ;;  %p1044_p12 = scmp.lt.u32.totalorder %s1365_s4, %s1428_s2 }
 0x16c   : > { %p1045_p13 = scmp.lt.u32.totalorder %s1043_s21, %s1039_s8  ;;  %p1047_p1 = scmp.lt.u32.totalorder %s1039_s8, %s1365_s4 }
 0x16d   : > { %p1041_p10 = pnand %p1040_p9, %p1191_p3 }
 0x16e   : > { %p1046_p0 = por %p1045_p13, %p1044_p12 }
 0x16f   : > { %p1042_p11 = pneg %p1041_p10 }
 0x170   : > { %p1048_p2 = por %p1047_p1, %p1046_p0 }
 0x172   : > { %p1049_p4 = pnand %p1048_p2, %p1042_p11 }
 0x174   : > { %1052 = shalt.err (!%p1049_p4)
}
 0x175   : > { %s1122_s26 = smov 128   ;;  %s1123_s28 = smov 256  }
 0x176   : > { %s1124_s30 = smov 8  }
 0x177   : > { %887 = dma.vmem_to_hbm [thread:$0]  (%p1191_p3), %s1367_s29, 2048, %s1365_s4, %s1374_s12, %s1122_s26, %s1123_s28, %s1124_s30  }
 0x178 PF: > { %p893_p5 = scmp.ge.s32.totalorder %s1119_s16, 2  ;;  %s598_s3 = sand.u32 1, %s1091_s9  }
 0x179   : > { %s599_s13 = scalar_lea.sflag [#allocation3], %s598_s3 }
 0x17a   : > { %p890_p6 = pnand %p893_p5, %p1200_p8 }
 0x17c   : > { %1086 = dma.done.wait (!%p890_p6), %s599_s13, 2048  }
 0x17d   : > { %1088 = vsyncadd (!%p890_p6), %s599_s13, 4294965248  ;;  %s15_s16 = sadd.s32 1, %s1119_s16   ;;  %s1433_s9 = smov %s1095_s10 }
 0x17e   : > { %p12_p7 = scmp.ge.s32.totalorder %s15_s16, 6   ;;  %s1434_s10 = smov %s1099_s11 }
 0x17f   : > { %s1435_s11 = smov %s1209_s27  ;;  %s1436_s12 = smov %s1111_s14 }
 0x180   : > { %s1437_s13 = smov %s1115_s15  ;;  %s1438_s14 = smov %s1441_s19 }
 0x181   : > { %s1439_s15 = smov %s1445_s20  ;;  %14 = sbr.rel (!%p12_p7) target bundleno = 5 (0x5), region = 66 }
 0x188   :  { %604 = vsyncpa [#allocation3], 1 }
 0x189   :  { %606 = vsyncpa [#allocation3 + $0x1], 1 }

</bundles_post_ra>
